<compile_context>
chip_gen: v7x
topology: tpu7x:2x2x1
jax: 0.10.0
libtpu: 0.0.40
codegen_flags: <defaults>
</compile_context>

<pallas_src>
from math import sqrt

import jax
import jax.numpy as jnp
from jax.experimental import pallas as pl
from jax.experimental.pallas import tpu as pltpu

_INV_SQRT2 = 1.0 / sqrt(2.0)


def _ffn_kernel(x_ref, w1_ref, b1_ref, w2_ref, b2_ref, o_ref, acc_ref):
    # x_ref:  (bm, H)    w1_ref: (H, bi)   b1_ref: (1, bi)
    # w2_ref: (bi, H)    b2_ref: (1, H)    o_ref:  (bm, H)   acc_ref: (bm, H) f32
    i = pl.program_id(1)

    @pl.when(i == 0)
    def _init():
        acc_ref[...] = jnp.zeros_like(acc_ref)

    # linear_1 on this I-tile: native-dtype operands straight to the MXU,
    # f32 accumulation.
    h = jnp.dot(x_ref[...], w1_ref[...], preferred_element_type=jnp.float32)
    h = h + b1_ref[...].astype(jnp.float32)

    # exact GELU (matches nn.GELU(approximate='none')); erf runs on the EUP,
    # which is otherwise idle while the MXU dominates.
    g = 0.5 * h * (1.0 + jax.lax.erf(h * _INV_SQRT2))

    # linear_2 partial product for this I-tile, accumulated in f32.
    acc_ref[...] += jnp.dot(g.astype(w2_ref.dtype), w2_ref[...],
                            preferred_element_type=jnp.float32)

    @pl.when(i == pl.num_programs(1) - 1)
    def _finalize():
        # b2 add + cast only once per M tile (dropout(eval) == identity).
        o_ref[...] = (acc_ref[...] + b2_ref[...].astype(jnp.float32)
                      ).astype(o_ref.dtype)


def feedforward_pallas(x, w1, b1, w2, b2, *, block_m=512, block_i=512):
    """x: (..., H). Weights stored as (in, out): w1 (H, I), w2 (I, H)."""
    H = x.shape[-1]
    I = w1.shape[-1]
    assert w1.shape == (H, I) and w2.shape == (I, H)
    lead = x.shape[:-1]
    x2d = x.reshape(-1, H)
    M = x2d.shape[0]

    # ---- tile sizes (respect the (8, 128) block-shape constraint) -----------
    if M <= block_m:
        bm, M_pad = M, M                       # full dim -> any size allowed
    else:
        bm = max((block_m // 8) * 8, 8)        # sublane-aligned sub-tile
        M_pad = pl.cdiv(M, bm) * bm
    if I <= block_i:
        bi, I_pad = I, I                       # full dim -> any size allowed
    else:
        bi = max((block_i // 128) * 128, 128)  # lane-aligned sub-tile
        I_pad = pl.cdiv(I, bi) * bi

    # ---- zero-pad ragged dims (zero I-padding contributes exactly 0) --------
    if M_pad != M:
        x2d = jnp.pad(x2d, ((0, M_pad - M), (0, 0)))
    if I_pad != I:
        w1 = jnp.pad(w1, ((0, 0), (0, I_pad - I)))
        b1 = jnp.pad(b1, ((0, I_pad - I),))
        w2 = jnp.pad(w2, ((0, I_pad - I), (0, 0)))

    b1_2d = b1.reshape(1, I_pad)
    b2_2d = b2.reshape(1, H)

    grid = (M_pad // bm, I_pad // bi)          # M parallel, I (reduction) last

    # ---- VMEM budget & cost hints --------------------------------------------
    itm = x2d.dtype.itemsize
    vmem_needed = (2 * bm * H * itm                      # x tiles (double-buffered)
                   + 2 * H * bi * w1.dtype.itemsize      # W1 tiles
                   + 2 * bi * b1.dtype.itemsize          # b1 tiles
                   + 2 * bi * H * w2.dtype.itemsize      # W2 tiles
                   + 2 * H * b2.dtype.itemsize           # b2
                   + 2 * bm * H * itm                    # out tiles
                   + bm * H * 4)                         # f32 accumulator
    vmem_limit = int(min(max(2 * vmem_needed, 8 << 20), 64 << 20))

    cost = pl.CostEstimate(
        flops=4 * M_pad * H * I_pad,                     # two matmuls
        transcendentals=M_pad * I_pad,                   # erf
        bytes_accessed=(2 * M_pad * H * itm              # x read + out write
                        + grid[0] * 2 * H * I_pad * w1.dtype.itemsize))

    out2d = pl.pallas_call(
        _ffn_kernel,
        out_shape=jax.ShapeDtypeStruct((M_pad, H), x.dtype),
        grid_spec=pltpu.PrefetchScalarGridSpec(
            num_scalar_prefetch=0,
            grid=grid,
            in_specs=[
                pl.BlockSpec((bm, H), lambda m, i: (m, 0)),   # x tile
                pl.BlockSpec((H, bi), lambda m, i: (0, i)),   # W1 I-tile
                pl.BlockSpec((1, bi), lambda m, i: (0, i)),   # b1 I-tile
                pl.BlockSpec((bi, H), lambda m, i: (i, 0)),   # W2 I-tile
                pl.BlockSpec((1, H), lambda m, i: (0, 0)),    # b2
            ],
            out_specs=pl.BlockSpec((bm, H), lambda m, i: (m, 0)),
            scratch_shapes=[pltpu.VMEM((bm, H), jnp.float32)],
        ),
        compiler_params=pltpu.CompilerParams(
            dimension_semantics=("parallel", "arbitrary"),
            vmem_limit_bytes=vmem_limit),
        cost_estimate=cost,
    )(x2d, w1, b1_2d, w2, b2_2d)

    out2d = out2d[:M]
    return out2d.reshape(*lead, H)


def _reference(x, w1, b1, w2, b2):
    h = x @ w1 + b1
    g = 0.5 * h * (1.0 + jax.lax.erf(h / jnp.sqrt(2.0)))
    return g @ w2 + b2


if __name__ == "__main__":
    # Config consistent with a tiny Transformer FFN:
    batch, seq = 2, 8
    hidden_size = 32
    intermediate_size = 64

    key = jax.random.PRNGKey(0)
    kx, k1, kb1, k2, kb2 = jax.random.split(key, 5)

    x = jax.random.normal(kx, (batch, seq, hidden_size), dtype=jnp.float32)

    # Deterministic param init (PyTorch-style uniform bounds), stored as (in, out).
    lim1 = 1.0 / sqrt(hidden_size)
    w1 = jax.random.uniform(k1, (hidden_size, intermediate_size),
                            minval=-lim1, maxval=lim1, dtype=jnp.float32)
    b1 = jax.random.uniform(kb1, (intermediate_size,),
                            minval=-lim1, maxval=lim1, dtype=jnp.float32)
    lim2 = 1.0 / sqrt(intermediate_size)
    w2 = jax.random.uniform(k2, (intermediate_size, hidden_size),
                            minval=-lim2, maxval=lim2, dtype=jnp.float32)
    b2 = jax.random.uniform(kb2, (hidden_size,),
                            minval=-lim2, maxval=lim2, dtype=jnp.float32)

    # 1) single-tile path (M <= block_m, I <= block_i at toy sizes)
    out = jax.block_until_ready(feedforward_pallas(x, w1, b1, w2, b2))
    ref = _reference(x, w1, b1, w2, b2)
    assert out.shape == (batch, seq, hidden_size)
    assert jnp.allclose(out, ref, atol=1e-5, rtol=1e-5)

    # 2) multi-M-tile path with ragged padding (M=10, bm=8 -> M_pad=16, grid=(2,1))
    x_r = jax.random.normal(kx, (batch, 5, hidden_size), dtype=jnp.float32)
    out_r = jax.block_until_ready(
        feedforward_pallas(x_r, w1, b1, w2, b2, block_m=8))
    ref_r = _reference(x_r, w1, b1, w2, b2)
    assert out_r.shape == (batch, 5, hidden_size)
    assert jnp.allclose(out_r, ref_r, atol=1e-5, rtol=1e-5)

    print("KERNEL_OK")
</pallas_src>

<mosaic_0001>
module attributes {stable_mosaic.version = 11 : i64} {
  func.func @_ffn_kernel(%arg0: i32, %arg1: i32, %arg2: memref<16x32xf32, #tpu.memory_space<vmem>>, %arg3: memref<32x64xf32, #tpu.memory_space<vmem>>, %arg4: memref<1x64xf32, #tpu.memory_space<vmem>>, %arg5: memref<64x32xf32, #tpu.memory_space<vmem>>, %arg6: memref<1x32xf32, #tpu.memory_space<vmem>>, %arg7: memref<16x32xf32, #tpu.memory_space<vmem>>, %arg8: memref<16x32xf32, #tpu.memory_space<vmem>>) attributes {dimension_semantics = [#tpu.dimension_semantics<parallel>, #tpu.dimension_semantics<arbitrary>], iteration_bounds = array<i64: 1, 1>, scalar_prefetch = 0 : i64, scratch_operands = 1 : i64, tpu.core_type = #tpu.core_type<tc>, window_params = [{transform_indices = @transform_0, window_bounds = array<i64: 16, 32>}, {transform_indices = @transform_1, window_bounds = array<i64: 32, 64>}, {transform_indices = @transform_2, window_bounds = array<i64: 1, 64>}, {transform_indices = @transform_3, window_bounds = array<i64: 64, 32>}, {pipeline_mode = #tpu.pipeline_mode<synchronous>, transform_indices = @transform_4, window_bounds = array<i64: 1, 32>}, {transform_indices = @transform_5, window_bounds = array<i64: 16, 32>}]} {
    %c0_i32 = arith.constant 0 : i32
    %0 = arith.cmpi eq, %arg1, %c0_i32 : i32
    %1 = arith.extui %0 : i1 to i32
    %c0_i32_0 = arith.constant 0 : i32
    %2 = arith.cmpi ne, %1, %c0_i32_0 : i32
    scf.if %2 {
      %cst_18 = arith.constant 0.000000e+00 : f32
      %25 = vector.broadcast %cst_18 : f32 to vector<16x32xf32>
      %c0_19 = arith.constant 0 : index
      %c0_20 = arith.constant 0 : index
      %26 = vector.load %arg8[%c0_19, %c0_20] : memref<16x32xf32, #tpu.memory_space<vmem>>, vector<16x32xf32>
      tpu.vector_store %arg8[%c0_19, %c0_20], %25 {strides = array<i32>} : memref<16x32xf32, #tpu.memory_space<vmem>>, vector<16x32xf32>,
    } else {
    }
    %c0 = arith.constant 0 : index
    %c0_1 = arith.constant 0 : index
    %3 = vector.load %arg2[%c0, %c0_1] : memref<16x32xf32, #tpu.memory_space<vmem>>, vector<16x32xf32>
    %c0_2 = arith.constant 0 : index
    %c0_3 = arith.constant 0 : index
    %4 = vector.load %arg3[%c0_2, %c0_3] : memref<32x64xf32, #tpu.memory_space<vmem>>, vector<32x64xf32>
    %cst = arith.constant dense<0.000000e+00> : vector<16x64xf32>
    %5 = tpu.matmul %3, %4, %cst {dimension_numbers = #tpu.dot_dimension_numbers<[1], [0], [0], [1], [0, 0, 1, 1], [], []>} : vector<16x32xf32>, vector<32x64xf32>, vector<16x64xf32> -> vector<16x64xf32>
    %c0_4 = arith.constant 0 : index
    %c0_5 = arith.constant 0 : index
    %6 = vector.load %arg4[%c0_4, %c0_5] : memref<1x64xf32, #tpu.memory_space<vmem>>, vector<1x64xf32>
    %7 = vector.broadcast %6 : vector<1x64xf32> to vector<16x64xf32>
    %8 = arith.addf %5, %7 : vector<16x64xf32>
    %cst_6 = arith.constant 5.000000e-01 : f32
    %9 = vector.broadcast %cst_6 : f32 to vector<16x64xf32>
    %10 = arith.mulf %9, %8 : vector<16x64xf32>
    %cst_7 = arith.constant 0.707106769 : f32
    %11 = vector.broadcast %cst_7 : f32 to vector<16x64xf32>
    %12 = arith.mulf %8, %11 : vector<16x64xf32>
    %13 = math.erf %12 : vector<16x64xf32>
    %cst_8 = arith.constant 1.000000e+00 : f32
    %14 = vector.broadcast %cst_8 : f32 to vector<16x64xf32>
    %15 = arith.addf %14, %13 : vector<16x64xf32>
    %16 = arith.mulf %10, %15 : vector<16x64xf32>
    %c0_9 = arith.constant 0 : index
    %c0_10 = arith.constant 0 : index
    %17 = vector.load %arg8[%c0_9, %c0_10] : memref<16x32xf32, #tpu.memory_space<vmem>>, vector<16x32xf32>
    %c0_11 = arith.constant 0 : index
    %c0_12 = arith.constant 0 : index
    %18 = vector.load %arg5[%c0_11, %c0_12] : memref<64x32xf32, #tpu.memory_space<vmem>>, vector<64x32xf32>
    %cst_13 = arith.constant dense<0.000000e+00> : vector<16x32xf32>
    %19 = tpu.matmul %16, %18, %cst_13 {dimension_numbers = #tpu.dot_dimension_numbers<[1], [0], [0], [1], [0, 0, 1, 1], [], []>} : vector<16x64xf32>, vector<64x32xf32>, vector<16x32xf32> -> vector<16x32xf32>
    %20 = arith.addf %17, %19 : vector<16x32xf32>
    %c0_14 = arith.constant 0 : index
    %c0_15 = arith.constant 0 : index
    %21 = vector.load %arg8[%c0_14, %c0_15] : memref<16x32xf32, #tpu.memory_space<vmem>>, vector<16x32xf32>
    tpu.vector_store %arg8[%c0_14, %c0_15], %20 {strides = array<i32>} : memref<16x32xf32, #tpu.memory_space<vmem>>, vector<16x32xf32>,
    %c0_i32_16 = arith.constant 0 : i32
    %22 = arith.cmpi eq, %arg1, %c0_i32_16 : i32
    %23 = arith.extui %22 : i1 to i32
    %c0_i32_17 = arith.constant 0 : i32
    %24 = arith.cmpi ne, %23, %c0_i32_17 : i32
    scf.if %24 {
      %c0_18 = arith.constant 0 : index
      %c0_19 = arith.constant 0 : index
      %25 = vector.load %arg8[%c0_18, %c0_19] : memref<16x32xf32, #tpu.memory_space<vmem>>, vector<16x32xf32>
      %c0_20 = arith.constant 0 : index
      %c0_21 = arith.constant 0 : index
      %26 = vector.load %arg6[%c0_20, %c0_21] : memref<1x32xf32, #tpu.memory_space<vmem>>, vector<1x32xf32>
      %27 = vector.broadcast %26 : vector<1x32xf32> to vector<16x32xf32>
      %28 = arith.addf %25, %27 : vector<16x32xf32>
      %c0_22 = arith.constant 0 : index
      %c0_23 = arith.constant 0 : index
      %29 = vector.load %arg7[%c0_22, %c0_23] : memref<16x32xf32, #tpu.memory_space<vmem>>, vector<16x32xf32>
      tpu.vector_store %arg7[%c0_22, %c0_23], %28 {strides = array<i32>} : memref<16x32xf32, #tpu.memory_space<vmem>>, vector<16x32xf32>,
    } else {
    }
    return
  }
  func.func @transform_0(%arg0: i32, %arg1: i32) -> (i32, i32) {
    %c0_i32 = arith.constant 0 : i32
    %c0_i32_0 = arith.constant 0 : i32
    return %arg0, %c0_i32 : i32, i32
  }
  func.func @transform_1(%arg0: i32, %arg1: i32) -> (i32, i32) {
    %c0_i32 = arith.constant 0 : i32
    %c0_i32_0 = arith.constant 0 : i32
    return %c0_i32, %arg1 : i32, i32
  }
  func.func @transform_2(%arg0: i32, %arg1: i32) -> (i32, i32) {
    %c0_i32 = arith.constant 0 : i32
    %c0_i32_0 = arith.constant 0 : i32
    return %c0_i32, %arg1 : i32, i32
  }
  func.func @transform_3(%arg0: i32, %arg1: i32) -> (i32, i32) {
    %c0_i32 = arith.constant 0 : i32
    %c0_i32_0 = arith.constant 0 : i32
    return %arg1, %c0_i32 : i32, i32
  }
  func.func @transform_4(%arg0: i32, %arg1: i32) -> (i32, i32) {
    %c0_i32 = arith.constant 0 : i32
    %c0_i32_0 = arith.constant 0 : i32
    %c0_i32_1 = arith.constant 0 : i32
    return %c0_i32, %c0_i32_0 : i32, i32
  }
  func.func @transform_5(%arg0: i32, %arg1: i32) -> (i32, i32) {
    %c0_i32 = arith.constant 0 : i32
    %c0_i32_0 = arith.constant 0 : i32
    return %arg0, %c0_i32 : i32, i32
  }
}

</mosaic_0001>

<bundles_post_ra>
// kernel: tpu_custom_call.1
= control target key start
LH: loop header
LB: loop body
LE: loop exit
PB: predicated region body
PF: predicated region fallthrough
CT: control target
= control target key end

     0   :  { %vm25_vm0 = vcmask 261120   ;;  %s471_s0 = inlined_call_operand.vmem [shape: f32[16,32], index: 0, kind: input, shape index: {}]   ;;  %s472_s1 = inlined_call_operand.vmem [shape: f32[32,64], index: 1, kind: input, shape index: {}]   ;;  %s473_s2 = inlined_call_operand.vmem [shape: f32[1,64], index: 2, kind: input, shape index: {}]   ;;  %s474_s3 = inlined_call_operand.vmem [shape: f32[64,32], index: 3, kind: input, shape index: {}]   ;;  %s475_s4 = inlined_call_operand.vmem [shape: f32[1,32], index: 4, kind: input, shape index: {}]   ;;  %s476_s5 = inlined_call_operand.hbm [shape: f32[16,32], index: 5, kind: output, shape index: {}]  }
   0x1   :  { %v30_v0 = vld [vmem:[%s472_s1] sm:$0xff]  ;;  %v31_v1 = vld [vmem:[%s472_s1 + $0x8] sm:$0xff]  ;;  %v32_v2 = vld [vmem:[%s472_s1 + $0x10] sm:$0xff] }
   0x2   :  { %v313_v3 = vpack.c.bf16 %v31_v1, %v30_v0  ;;  %v33_v4 = vld [vmem:[%s472_s1 + $0x18] sm:$0xff]  ;;  %v28_v5 = vld [vmem:[%s471_s0] sm:$0xff] }
   0x3   :  { %v317_v6 = vpack.c.bf16 %v33_v4, %v32_v2  ;;  %291 = vmatprep.mubr.msk.f32.mxu0 %vm25_vm0, %v28_v5 }
   0x4   :  { %10 = vsyncpa [#allocation4], 0  ;;  %314 = vmatprep.subr.bf16.mxu0 %v313_v3  ;;  %v29_v7 = vld [vmem:[%s471_s0 + $0x8] sm:$0xff]  ;;  %v135_v8 = vld [vmem:[%s474_s3] sm:$0xff]  ;;  %v369_v20 = vmov 0.0   ;;  %vm143_vm1 = vcmask 523264  }
   0x5   :  { %316 = vmatpush3.bf16.msra.mxu0 %v313_v3  ;;  %v136_v9 = vld [vmem:[%s474_s3 + $0x8] sm:$0xff]  ;;  %v137_v11 = vld [vmem:[%s474_s3 + $0x10] sm:$0xff]  ;;  %v138_v12 = vld [vmem:[%s474_s3 + $0x18] sm:$0xff]  ;;  %27 = vst.msk [vmem:[#allocation2 + $0x8] sm:$0xff] %vm25_vm0, %v369_v20  ;;  %s370_s21 = smov [#allocation3]  }
   0x6   :  { %318 = vmatprep.subr.bf16.mxu0 %v317_v6  ;;  %v321_v10 = vpack.c.bf16 %v136_v9, %v135_v8  ;;  %v325_v13 = vpack.c.bf16 %v138_v12, %v137_v11  ;;  %v139_v14 = vld [vmem:[%s474_s3 + $0x20] sm:$0xff]  ;;  %v140_v15 = vld [vmem:[%s474_s3 + $0x28] sm:$0xff]  ;;  %v141_v17 = vld [vmem:[%s474_s3 + $0x30] sm:$0xff]  ;;  %26 = vst.msk [vmem:[#allocation2] sm:$0xff] %vm25_vm0, %v369_v20  ;;  %s250_s22 = sshll.u32 %s370_s21, 4  ;;  %s251_s22 = int_to_ptr.vmem [resolvable:$true] %s250_s22 }
   0x7   :  { %v329_v16 = vpack.c.bf16 %v140_v15, %v139_v14  ;;  %v142_v18 = vld [vmem:[%s474_s3 + $0x38] sm:$0xff]  ;;  %v261_v21 = vld [vmem:[%s473_s2] ss:$0 sm:$0xff]  ;;  %s345_s23 = scalar_lea.vmem %s251_s22, 256  ;;  %p350_p1 = scmp.lt.s32.totalorder %s251_s22, %s251_s22 }
   0x8   :  { %322 = vmatprep.subr.bf16.mxu1 %v321_v10  ;;  %v333_v19 = vpack.c.bf16 %v142_v18, %v141_v17  ;;  %v266_v42 = vld [vmem:[%s475_s4] ss:$0 sm:$0xff]  ;;  %p346_p0 = scmp.ne.s32.totalorder %s251_s22, %s345_s23  ;;  %p351_p2 = scmp.lt.s32.totalorder %s345_s23, %s345_s23 }
   0x9   :  { %320 = vmatpush3.bf16.msra.mxu0 %v317_v6  ;;  %324 = vmatpush3.bf16.msra.mxu1 %v321_v10 }
   0xa   :  { %326 = vmatprep.subr.bf16.mxu1 %v325_v13  ;;  %p352_p3 = por %p351_p2, %p350_p1 }
   0xc   :  { %292 = vmatmul.mubr.msk.f32.vlgmr.msra.gmra.mrb[0].mxu0 %vm25_vm0, %v29_v7  ;;  %v134_v36 = vld [vmem:[#allocation2 + $0x8] sm:$0xff]  ;;  %p353_p4 = pnand %p352_p3, %p346_p0 }
   0xd   :  { %328 = vmatpush3.bf16.msra.mxu1 %v325_v13  ;;  %v133_v37 = vld [vmem:[#allocation2] sm:$0xff] }
   0xe   :  { %330 = vmatprep.subr.bf16.mxu1 %v329_v16 }
  0x11   :  { %332 = vmatpush3.bf16.msra.mxu1 %v329_v16 }
  0x12   :  { %334 = vmatprep.subr.bf16.mxu1 %v333_v19 }
  0x15   :  { %336 = vmatpush3.bf16.msra.mxu1 %v333_v19 }
  0xdf   :  { %v293_v22 = vpop.f32.mrb[0].mxu0 }
  0xe0   :  { %v120_v23 = vadd.f32 %v293_v22, %v261_v21  ;;  %v114_v24 = vpop.f32.mrb[1].mxu0 }
  0xe1   :  { %v115_v25 = vadd.f32 %v261_v21, %v114_v24 }
  0xe2   :  { %v126_v26 = vmul.f32 0.70710677, %v120_v23  ;;  %v124_v33 = vmul.f32 0.5, %v120_v23 }
  0xe3   :  { %v125_v27 = vmul.f32 0.70710677, %v115_v25  ;;  %v123_v31 = vmul.f32 0.5, %v115_v25 }
  0xe4   :  { %341 = verf.f32 %v126_v26 }
  0xe5   :  { %343 = verf.f32 %v125_v27 }
  0xee   :  { %v342_v28 = vpop.eup %341 }
  0xef   :  { %v344_v29 = vpop.eup %343  ;;  %v130_v30 = vadd.f32 1.0, %v342_v28 }
  0xf0   :  { %v129_v32 = vadd.f32 1.0, %v344_v29 }
  0xf1   :  { %v132_v35 = vmul.f32 %v130_v30, %v124_v33 }
  0xf2   :  { %v131_v34 = vmul.f32 %v129_v32, %v123_v31 }
  0xf4   :  { %310 = vmatprep.mubr.msk.f32.mxu1 %vm143_vm1, %v131_v34 }
  0xf5   :  { %311 = vmatmul.mubr.msk.f32.vlgmr.msra.gmra.mrb[0].mxu1 %vm143_vm1, %v132_v35 }
 0x1c8   :  { %v312_v38 = vpop.f32.mrb[0].mxu1 }
 0x1c9   :  { %v226_v39 = vadd.f32 %v312_v38, %v134_v36  ;;  %v216_v40 = vpop.f32.mrb[1].mxu1 }
 0x1ca   :  { %v225_v41 = vadd.f32 %v216_v40, %v133_v37 }
 0x1cb   :  { %228 = vst.msk [vmem:[#allocation2 + $0x8] sm:$0xff] %vm25_vm0, %v226_v39 }
 0x1cc   :  { %227 = vst.msk [vmem:[#allocation2] sm:$0xff] %vm25_vm0, %v225_v41 }
 0x1d2   :  { %v233_v43 = vld [vmem:[#allocation2 + $0x8] sm:$0xff] }
 0x1d3   :  { %v232_v44 = vld [vmem:[#allocation2] sm:$0xff]  ;;  %v242_v45 = vadd.f32 %v266_v42, %v233_v43 }
 0x1d4   :  { %v241_v46 = vadd.f32 %v266_v42, %v232_v44 }
 0x1d5   :  { %244 = vst.msk [vmem:[#allocation3 + $0x8] sm:$0xff] %vm25_vm0, %v242_v45 }
 0x1d6   :  { %243 = vst.msk [vmem:[#allocation3] sm:$0xff] %vm25_vm0, %v241_v46 }
 0x1d7   :  { %356 = shalt.err (!%p353_p4)
}
 0x1d8   :  { %s357_s25 = scalar_lea.hbm %s476_s5, 256 }
 0x1d9   :  { %p358_p5 = scmp.ne.s32.totalorder %s476_s5, %s357_s25  ;;  %p361_p6 = scmp.lt.u32.totalorder %s357_s25, %s476_s5 }
 0x1db   :  { %p363_p7 = pnand %p361_p6, %p358_p5 }
 0x1dd   :  { %366 = shalt.err (!%p363_p7)
}
 0x1de   :  { %s371_s30 = smov 128   ;;  %s372_s1 = smov 8  }
 0x1df   :  { %256 = dma.vmem_to_hbm [thread:$0]  %s251_s22, 256, %s476_s5, [#allocation4], %s371_s30, %s371_s30, %s372_s1  }
 0x1e0   :  { %367 = dma.done.wait [#allocation4], 256  }
 0x1e1   :  { %368 = vsyncadd [#allocation4], 4294967040 }
 0x1e2   :  { %260 = vsyncpa [#allocation4], 1 }

</bundles_post_ra>
